<compile_context>
chip_gen: v7x
topology: tpu7x:2x2x1
jax: 0.10.0
libtpu: 0.0.40
codegen_flags: <defaults>
</compile_context>

<pallas_src>
import jax
import jax.numpy as jnp
from jax.experimental import pallas as pl
from jax.experimental.pallas import tpu as pltpu


def _banded_weights(w_oihw, W):
    """(Cout, Cin, KH, KW) PyTorch conv weight -> (KH, W*Cin, W*Cout) banded matrices.

    band[kh][wi*Cin + ci, wo*Cout + co] = w[co, ci, kh, kw] with kw = wi - wo + pad
    (zero outside the band), so  out[h, :] = sum_kh x_hpad[h + kh, :] @ band[kh]
    implements the 'same' convolution; W zero-padding is folded into the band, only
    H padding remains for the caller.
    """
    Cout, Cin, KH, KW = w_oihw.shape
    pad = (KW - 1) // 2
    whc = jnp.transpose(w_oihw, (2, 3, 1, 0))            # (KH, KW, Cin, Cout)
    # sel[kw, wi, wo] = 1  iff  wi == wo + kw - pad
    sel = jnp.stack([jnp.eye(W, W, k=pad - kw, dtype=w_oihw.dtype)
                     for kw in range(KW)])               # (KW, W, W)
    band = jnp.einsum("kiw,akcd->aicwd", sel, whc)       # (KH, W, Cin, W, Cout)
    return band.reshape(KH, W * Cin, W * Cout)


def _make_residual_block_kernel(H, L, KH, mxu_dtype):
    PAD = (KH - 1) // 2

    def conv(xp_ref, band_ref, bias_ref):
        # One fused MXU matmul: (H, KH*L) @ (KH*L, L), f32 accumulation, f32 bias.
        xk = jnp.concatenate([xp_ref[kh:kh + H, :] for kh in range(KH)], axis=1)
        acc = jnp.dot(xk.astype(mxu_dtype), band_ref[...],
                      preferred_element_type=jnp.float32)
        return acc + bias_ref[...]                       # (H, L) + (1, L)

    def kernel(x_ref, band1_ref, band2_ref, b1_ref, b2_ref, out_ref, xp_ref):
        # Zero only the H-halo rows of the persistent scratch (tiny; done every step so the
        # kernel is also correct when the parallel grid axis is split across TensorCores).
        xp_ref[0:PAD, :] = jnp.zeros((PAD, L), jnp.float32)
        xp_ref[PAD + H:PAD + H + PAD, :] = jnp.zeros((PAD, L), jnp.float32)

        xp_ref[PAD:PAD + H, :] = x_ref[0]                               # (H, L) f32
        y1 = jnp.maximum(conv(xp_ref, band1_ref, b1_ref), 0.0)          # relu(conv1(x)+b1)
        xp_ref[PAD:PAD + H, :] = y1
        y2 = conv(xp_ref, band2_ref, b2_ref) + y1                       # conv2(y1)+b2 + y1
        out_ref[0] = jnp.maximum(y2, 0.0).astype(out_ref.dtype)

    return kernel


def residual_block_forward(x_nchw, params):
    """Forward pass matching the PyTorch ResidualBlock (NCHW in, NCHW out)."""
    N, C, H, W = x_nchw.shape
    KH = params["w1"].shape[2]
    WC = W * C
    mxu_dtype = jnp.bfloat16

    # Pack P images along lanes so the lane axis is >= 128 (here P=2 -> L=128).
    P = max(1, -(-128 // WC))
    G = -(-N // P)
    Npad = G * P
    L = P * WC

    # NCHW -> NHWC -> (N, H, W*C), pad batch to a multiple of P, pack pairs along lanes.
    x = jnp.transpose(x_nchw, (0, 2, 3, 1)).reshape(N, H, WC)
    if Npad != N:
        x = jnp.concatenate([x, jnp.zeros((Npad - N, H, WC), x.dtype)], axis=0)
    x = x.reshape(G, P, H, WC).transpose(0, 2, 1, 3).reshape(G, H, L)

    # Banded (Toeplitz-in-W) weights -> block-diagonal over the P lane-packed images
    # -> fuse KH into the contraction dim -> (KH*L, L) bf16 MXU operand.
    eye_p = jnp.eye(P, dtype=jnp.float32)

    def fuse(w):
        band = _banded_weights(w, W)                                    # (KH, WC, WC) f32
        bd = jax.vmap(lambda b: jnp.kron(eye_p, b))(band)               # (KH, L, L) block-diag
        return bd.reshape(KH * L, L).astype(mxu_dtype)

    band1 = fuse(params["w1"])
    band2 = fuse(params["w2"])
    bias1 = jnp.tile(params["b1"], W * P)[None, :]                      # (1, L): lane -> b[c]
    bias2 = jnp.tile(params["b2"], W * P)[None, :]

    kernel = _make_residual_block_kernel(H, L, KH, mxu_dtype)

    out = pl.pallas_call(
        kernel,
        out_shape=jax.ShapeDtypeStruct((G, H, L), x_nchw.dtype),
        grid=(G,),
        in_specs=[
            pl.BlockSpec((1, H, L), lambda g: (g, 0, 0)),        # lane-packed image pair
            pl.BlockSpec((KH * L, L), lambda g: (0, 0)),         # fused banded conv1 weights
            pl.BlockSpec((KH * L, L), lambda g: (0, 0)),         # fused banded conv2 weights
            pl.BlockSpec((1, L), lambda g: (0, 0)),              # tiled bias1
            pl.BlockSpec((1, L), lambda g: (0, 0)),              # tiled bias2
        ],
        out_specs=pl.BlockSpec((1, H, L), lambda g: (g, 0, 0)),
        scratch_shapes=[pltpu.VMEM((H + KH - 1, L), jnp.float32)],      # persistent H-halo slab
        compiler_params=pltpu.CompilerParams(
            dimension_semantics=("parallel",),
            vmem_limit_bytes=32 * 1024 * 1024),
    )(x, band1, band2, bias1, bias2)

    # Unpack lanes back to images, drop batch padding, NHWC -> NCHW.
    out = out.reshape(G, H, P, WC).transpose(0, 2, 1, 3).reshape(Npad, H, W, C)[:N]
    return jnp.transpose(out, (0, 3, 1, 2))


def _reference_forward(x_nchw, params, operand_dtype=jnp.float32):
    """Pure-JAX reference (lax conv). operand_dtype mirrors the kernel's MXU operand dtype."""
    def conv(x, w, b):
        y = jax.lax.conv_general_dilated(
            x.astype(operand_dtype), w.astype(operand_dtype),
            window_strides=(1, 1), padding=((2, 2), (2, 2)),
            dimension_numbers=("NCHW", "OIHW", "NCHW"),
            preferred_element_type=jnp.float32)
        return y + b[None, :, None, None]

    y1 = jax.nn.relu(conv(x_nchw, params["w1"], params["b1"]))
    y2 = jax.nn.relu(conv(y1, params["w2"], params["b2"]) + y1)
    return y2


def init_params(key, in_channels, ksize=5):
    """Deterministic init mimicking PyTorch Conv2d default (uniform +/- 1/sqrt(fan_in))."""
    k1, k2, k3, k4 = jax.random.split(key, 4)
    fan_in = in_channels * ksize * ksize
    bound = 1.0 / jnp.sqrt(fan_in)
    shape_w = (in_channels, in_channels, ksize, ksize)   # (Cout, Cin, kh, kw) like PyTorch
    return {
        "w1": jax.random.uniform(k1, shape_w, jnp.float32, -bound, bound),
        "b1": jax.random.uniform(k2, (in_channels,), jnp.float32, -bound, bound),
        "w2": jax.random.uniform(k3, shape_w, jnp.float32, -bound, bound),
        "b2": jax.random.uniform(k4, (in_channels,), jnp.float32, -bound, bound),
    }


if __name__ == "__main__":
    key = jax.random.PRNGKey(0)
    k_x, k_p = jax.random.split(key)

    N, C, H, W = 2, 4, 16, 16
    x = jax.random.normal(k_x, (N, C, H, W), jnp.float32)        # NCHW like PyTorch
    params = init_params(k_p, C)

    out = jax.block_until_ready(residual_block_forward(x, params))
    assert out.shape == (N, C, H, W)

    # Tight check vs a reference using the same bf16 MXU operands (f32 accumulation): only
    # summation-order differences remain.
    ref_bf16 = jax.block_until_ready(_reference_forward(x, params, jnp.bfloat16))
    assert jnp.allclose(out, ref_bf16, rtol=1e-3, atol=1e-3), "mismatch vs bf16-operand reference"

    # Semantics check vs the exact f32 PyTorch-equivalent reference (tolerance covers bf16
    # operand rounding on the MXU).
    ref_f32 = jax.block_until_ready(_reference_forward(x, params, jnp.float32))
    assert jnp.allclose(out, ref_f32, rtol=3e-2, atol=3e-2), "mismatch vs f32 reference"

    print("KERNEL_OK")
</pallas_src>

<mosaic_0001>
module attributes {stable_mosaic.version = 11 : i64} {
  func.func @kernel(%arg0: i32, %arg1: memref<1x16x128xf32, #tpu.memory_space<vmem>>, %arg2: memref<640x128xbf16, #tpu.memory_space<vmem>>, %arg3: memref<640x128xbf16, #tpu.memory_space<vmem>>, %arg4: memref<1x128xf32, #tpu.memory_space<vmem>>, %arg5: memref<1x128xf32, #tpu.memory_space<vmem>>, %arg6: memref<1x16x128xf32, #tpu.memory_space<vmem>>, %arg7: memref<20x128xf32, #tpu.memory_space<vmem>>) attributes {dimension_semantics = [#tpu.dimension_semantics<parallel>], iteration_bounds = array<i64: 1>, scalar_prefetch = 0 : i64, scratch_operands = 1 : i64, tpu.core_type = #tpu.core_type<tc>, window_params = [{transform_indices = @transform_0, window_bounds = array<i64: 1, 16, 128>}, {pipeline_mode = #tpu.pipeline_mode<synchronous>, transform_indices = @transform_1, window_bounds = array<i64: 640, 128>}, {pipeline_mode = #tpu.pipeline_mode<synchronous>, transform_indices = @transform_2, window_bounds = array<i64: 640, 128>}, {pipeline_mode = #tpu.pipeline_mode<synchronous>, transform_indices = @transform_3, window_bounds = array<i64: 1, 128>}, {pipeline_mode = #tpu.pipeline_mode<synchronous>, transform_indices = @transform_4, window_bounds = array<i64: 1, 128>}, {transform_indices = @transform_5, window_bounds = array<i64: 1, 16, 128>}]} {
    %cst = arith.constant 0.000000e+00 : f32
    %0 = vector.broadcast %cst : f32 to vector<2x128xf32>
    %c0 = arith.constant 0 : index
    %c0_0 = arith.constant 0 : index
    %1 = vector.load %arg7[%c0, %c0_0] : memref<20x128xf32, #tpu.memory_space<vmem>>, vector<2x128xf32>
    tpu.vector_store %arg7[%c0, %c0_0], %0 {strides = array<i32>} : memref<20x128xf32, #tpu.memory_space<vmem>>, vector<2x128xf32>,
    %cst_1 = arith.constant 0.000000e+00 : f32
    %2 = vector.broadcast %cst_1 : f32 to vector<2x128xf32>
    %c18 = arith.constant 18 : index
    %c0_2 = arith.constant 0 : index
    %3 = vector.load %arg7[%c18, %c0_2] : memref<20x128xf32, #tpu.memory_space<vmem>>, vector<2x128xf32>
    tpu.vector_store %arg7[%c18, %c0_2], %2 {strides = array<i32>} : memref<20x128xf32, #tpu.memory_space<vmem>>, vector<2x128xf32>,
    %c0_3 = arith.constant 0 : index
    %c0_4 = arith.constant 0 : index
    %c0_5 = arith.constant 0 : index
    %4 = vector.load %arg1[%c0_3, %c0_4, %c0_5] : memref<1x16x128xf32, #tpu.memory_space<vmem>>, vector<1x16x128xf32>
    %5 = vector.shape_cast %4 : vector<1x16x128xf32> to vector<16x128xf32>
    %c2 = arith.constant 2 : index
    %c0_6 = arith.constant 0 : index
    %6 = vector.load %arg7[%c2, %c0_6] : memref<20x128xf32, #tpu.memory_space<vmem>>, vector<16x128xf32>
    tpu.vector_store %arg7[%c2, %c0_6], %5 {strides = array<i32>} : memref<20x128xf32, #tpu.memory_space<vmem>>, vector<16x128xf32>,
    %c0_7 = arith.constant 0 : index
    %c0_8 = arith.constant 0 : index
    %7 = vector.load %arg7[%c0_7, %c0_8] : memref<20x128xf32, #tpu.memory_space<vmem>>, vector<16x128xf32>
    %c1 = arith.constant 1 : index
    %c0_9 = arith.constant 0 : index
    %8 = vector.load %arg7[%c1, %c0_9] : memref<20x128xf32, #tpu.memory_space<vmem>>, vector<16x128xf32>
    %c2_10 = arith.constant 2 : index
    %c0_11 = arith.constant 0 : index
    %9 = vector.load %arg7[%c2_10, %c0_11] : memref<20x128xf32, #tpu.memory_space<vmem>>, vector<16x128xf32>
    %c3 = arith.constant 3 : index
    %c0_12 = arith.constant 0 : index
    %10 = vector.load %arg7[%c3, %c0_12] : memref<20x128xf32, #tpu.memory_space<vmem>>, vector<16x128xf32>
    %c4 = arith.constant 4 : index
    %c0_13 = arith.constant 0 : index
    %11 = vector.load %arg7[%c4, %c0_13] : memref<20x128xf32, #tpu.memory_space<vmem>>, vector<16x128xf32>
    %12 = tpu.concatenate %7, %8, %9, %10, %11 in 1 : vector<16x128xf32>, vector<16x128xf32>, vector<16x128xf32>, vector<16x128xf32>, vector<16x128xf32> -> vector<16x640xf32>
    %13 = arith.truncf %12 : vector<16x640xf32> to vector<16x640xbf16>
    %c0_14 = arith.constant 0 : index
    %c0_15 = arith.constant 0 : index
    %14 = vector.load %arg2[%c0_14, %c0_15] : memref<640x128xbf16, #tpu.memory_space<vmem>>, vector<640x128xbf16>
    %cst_16 = arith.constant dense<0.000000e+00> : vector<16x128xf32>
    %15 = tpu.matmul %13, %14, %cst_16 {dimension_numbers = #tpu.dot_dimension_numbers<[1], [0], [0], [1], [0, 0, 1, 1], [], []>} : vector<16x640xbf16>, vector<640x128xbf16>, vector<16x128xf32> -> vector<16x128xf32>
    %c0_17 = arith.constant 0 : index
    %c0_18 = arith.constant 0 : index
    %16 = vector.load %arg4[%c0_17, %c0_18] : memref<1x128xf32, #tpu.memory_space<vmem>>, vector<1x128xf32>
    %17 = vector.broadcast %16 : vector<1x128xf32> to vector<16x128xf32>
    %18 = arith.addf %15, %17 : vector<16x128xf32>
    %cst_19 = arith.constant 0.000000e+00 : f32
    %19 = vector.broadcast %cst_19 : f32 to vector<16x128xf32>
    %20 = arith.maximumf %18, %19 : vector<16x128xf32>
    %c2_20 = arith.constant 2 : index
    %c0_21 = arith.constant 0 : index
    %21 = vector.load %arg7[%c2_20, %c0_21] : memref<20x128xf32, #tpu.memory_space<vmem>>, vector<16x128xf32>
    tpu.vector_store %arg7[%c2_20, %c0_21], %20 {strides = array<i32>} : memref<20x128xf32, #tpu.memory_space<vmem>>, vector<16x128xf32>,
    %c0_22 = arith.constant 0 : index
    %c0_23 = arith.constant 0 : index
    %22 = vector.load %arg7[%c0_22, %c0_23] : memref<20x128xf32, #tpu.memory_space<vmem>>, vector<16x128xf32>
    %c1_24 = arith.constant 1 : index
    %c0_25 = arith.constant 0 : index
    %23 = vector.load %arg7[%c1_24, %c0_25] : memref<20x128xf32, #tpu.memory_space<vmem>>, vector<16x128xf32>
    %c2_26 = arith.constant 2 : index
    %c0_27 = arith.constant 0 : index
    %24 = vector.load %arg7[%c2_26, %c0_27] : memref<20x128xf32, #tpu.memory_space<vmem>>, vector<16x128xf32>
    %c3_28 = arith.constant 3 : index
    %c0_29 = arith.constant 0 : index
    %25 = vector.load %arg7[%c3_28, %c0_29] : memref<20x128xf32, #tpu.memory_space<vmem>>, vector<16x128xf32>
    %c4_30 = arith.constant 4 : index
    %c0_31 = arith.constant 0 : index
    %26 = vector.load %arg7[%c4_30, %c0_31] : memref<20x128xf32, #tpu.memory_space<vmem>>, vector<16x128xf32>
    %27 = tpu.concatenate %22, %23, %24, %25, %26 in 1 : vector<16x128xf32>, vector<16x128xf32>, vector<16x128xf32>, vector<16x128xf32>, vector<16x128xf32> -> vector<16x640xf32>
    %28 = arith.truncf %27 : vector<16x640xf32> to vector<16x640xbf16>
    %c0_32 = arith.constant 0 : index
    %c0_33 = arith.constant 0 : index
    %29 = vector.load %arg3[%c0_32, %c0_33] : memref<640x128xbf16, #tpu.memory_space<vmem>>, vector<640x128xbf16>
    %cst_34 = arith.constant dense<0.000000e+00> : vector<16x128xf32>
    %30 = tpu.matmul %28, %29, %cst_34 {dimension_numbers = #tpu.dot_dimension_numbers<[1], [0], [0], [1], [0, 0, 1, 1], [], []>} : vector<16x640xbf16>, vector<640x128xbf16>, vector<16x128xf32> -> vector<16x128xf32>
    %c0_35 = arith.constant 0 : index
    %c0_36 = arith.constant 0 : index
    %31 = vector.load %arg5[%c0_35, %c0_36] : memref<1x128xf32, #tpu.memory_space<vmem>>, vector<1x128xf32>
    %32 = vector.broadcast %31 : vector<1x128xf32> to vector<16x128xf32>
    %33 = arith.addf %30, %32 : vector<16x128xf32>
    %34 = arith.addf %33, %20 : vector<16x128xf32>
    %cst_37 = arith.constant 0.000000e+00 : f32
    %35 = vector.broadcast %cst_37 : f32 to vector<16x128xf32>
    %36 = arith.maximumf %34, %35 : vector<16x128xf32>
    %c0_38 = arith.constant 0 : index
    %c0_39 = arith.constant 0 : index
    %c0_40 = arith.constant 0 : index
    %37 = vector.load %arg6[%c0_38, %c0_39, %c0_40] : memref<1x16x128xf32, #tpu.memory_space<vmem>>, vector<1x16x128xf32>
    %38 = vector.shape_cast %37 : vector<1x16x128xf32> to vector<16x128xf32>
    %39 = vector.shape_cast %36 : vector<16x128xf32> to vector<1x16x128xf32>
    tpu.vector_store %arg6[%c0_38, %c0_39, %c0_40], %39 {strides = array<i32>} : memref<1x16x128xf32, #tpu.memory_space<vmem>>, vector<1x16x128xf32>,
    return
  }
  func.func @transform_0(%arg0: i32) -> (i32, i32, i32) {
    %c0_i32 = arith.constant 0 : i32
    %c0_i32_0 = arith.constant 0 : i32
    %c0_i32_1 = arith.constant 0 : i32
    return %arg0, %c0_i32, %c0_i32_0 : i32, i32, i32
  }
  func.func @transform_1(%arg0: i32) -> (i32, i32) {
    %c0_i32 = arith.constant 0 : i32
    %c0_i32_0 = arith.constant 0 : i32
    %c0_i32_1 = arith.constant 0 : i32
    return %c0_i32, %c0_i32_0 : i32, i32
  }
  func.func @transform_2(%arg0: i32) -> (i32, i32) {
    %c0_i32 = arith.constant 0 : i32
    %c0_i32_0 = arith.constant 0 : i32
    %c0_i32_1 = arith.constant 0 : i32
    return %c0_i32, %c0_i32_0 : i32, i32
  }
  func.func @transform_3(%arg0: i32) -> (i32, i32) {
    %c0_i32 = arith.constant 0 : i32
    %c0_i32_0 = arith.constant 0 : i32
    %c0_i32_1 = arith.constant 0 : i32
    return %c0_i32, %c0_i32_0 : i32, i32
  }
  func.func @transform_4(%arg0: i32) -> (i32, i32) {
    %c0_i32 = arith.constant 0 : i32
    %c0_i32_0 = arith.constant 0 : i32
    %c0_i32_1 = arith.constant 0 : i32
    return %c0_i32, %c0_i32_0 : i32, i32
  }
  func.func @transform_5(%arg0: i32) -> (i32, i32, i32) {
    %c0_i32 = arith.constant 0 : i32
    %c0_i32_0 = arith.constant 0 : i32
    %c0_i32_1 = arith.constant 0 : i32
    return %arg0, %c0_i32, %c0_i32_0 : i32, i32, i32
  }
}

</mosaic_0001>

<bundles_post_ra>
// kernel: tpu_custom_call.1
= control target key start
LH: loop header
LB: loop body
LE: loop exit
PB: predicated region body
PF: predicated region fallthrough
CT: control target
= control target key end

     0   :  { %10 = vsyncpa [#allocation4], 0  ;;  %s1577_s0 = inlined_call_operand.hbm [shape: f32[1,16,128], index: 0, kind: input, shape index: {}]   ;;  %s1578_s1 = inlined_call_operand.hbm [shape: bf16[640,128], index: 1, kind: input, shape index: {}]   ;;  %s1579_s2 = inlined_call_operand.hbm [shape: bf16[640,128], index: 2, kind: input, shape index: {}]   ;;  %s1580_s3 = inlined_call_operand.vmem [shape: f32[1,128], index: 3, kind: input, shape index: {}]   ;;  %s1581_s4 = inlined_call_operand.vmem [shape: f32[1,128], index: 4, kind: input, shape index: {}]   ;;  %s1582_s5 = inlined_call_operand.hbm [shape: f32[1,16,128], index: 5, kind: output, shape index: {}]  }
   0x1   :  { %11 = vsyncpa [#allocation7], 0 }
   0x2   :  { %12 = vsyncpa [#allocation5], 0  ;;  %s1439_s18 = smov [#allocation6]   ;;  %s1345_s22 = scalar_lea.hbm %s1578_s1, 5120 }
   0x3   :  { %s30_s19 = sshll.u32 %s1439_s18, 4  ;;  %p1346_p0 = scmp.ne.s32.totalorder %s1578_s1, %s1345_s22  ;;  %s31_s19 = int_to_ptr.vmem [resolvable:$true] %s30_s19 }
   0x4   :  { %p1349_p1 = scmp.lt.u32.totalorder %s1345_s22, %s1578_s1 }
   0x6   :  { %p1351_p2 = pnand %p1349_p1, %p1346_p0 }
   0x8   :  { %1354 = shalt.err (!%p1351_p2)
}
   0x9   :  { %s1355_s27 = scalar_lea.vmem %s31_s19, 5120  ;;  %p1360_p4 = scmp.lt.s32.totalorder %s31_s19, %s31_s19 }
   0xa   :  { %p1356_p3 = scmp.ne.s32.totalorder %s31_s19, %s1355_s27  ;;  %p1361_p5 = scmp.lt.s32.totalorder %s1355_s27, %s1355_s27 }
   0xc   :  { %p1362_p6 = por %p1361_p5, %p1360_p4 }
   0xe   :  { %p1363_p7 = pnand %p1362_p6, %p1356_p3 }
  0x10   :  { %1366 = shalt.err (!%p1363_p7)
}
  0x11   :  { %s1440_s28 = smov 64   ;;  %s1441_s29 = smov 4  }
  0x12   :  { %36 = dma.hbm_to_vmem [thread:$0]  %s1578_s1, 5120, %s31_s19, [#allocation7], %s1440_s28, %s1440_s28, %s1441_s29  }
  0x13   :  { %s1442_s7 = smov [#allocation3]   ;;  %s1367_s11 = scalar_lea.hbm %s1577_s0, 256 }
  0x14   :  { %s18_s8 = sshll.u32 %s1442_s7, 4  ;;  %p1368_p8 = scmp.ne.s32.totalorder %s1577_s0, %s1367_s11  ;;  %s19_s8 = int_to_ptr.vmem [resolvable:$true] %s18_s8 }
  0x15   :  { %p1371_p9 = scmp.lt.u32.totalorder %s1367_s11, %s1577_s0 }
  0x17   :  { %p1373_p10 = pnand %p1371_p9, %p1368_p8 }
  0x19   :  { %1376 = shalt.err (!%p1373_p10)
}
  0x1a   :  { %s1377_s16 = scalar_lea.vmem %s19_s8, 256  ;;  %p1382_p12 = scmp.lt.s32.totalorder %s19_s8, %s19_s8 }
  0x1b   :  { %p1378_p11 = scmp.ne.s32.totalorder %s19_s8, %s1377_s16  ;;  %p1383_p13 = scmp.lt.s32.totalorder %s1377_s16, %s1377_s16 }
  0x1d   :  { %p1384_p0 = por %p1383_p13, %p1382_p12 }
  0x1f   :  { %p1385_p1 = pnand %p1384_p0, %p1378_p11 }
  0x21   :  { %1388 = shalt.err (!%p1385_p1)
}
  0x22   :  { %s1443_s1 = smov 128   ;;  %s1444_s17 = smov 8  }
  0x23   :  { %24 = dma.hbm_to_vmem [thread:$0]  %s1577_s0, 256, %s19_s8, [#allocation4], %s1443_s1, %s1443_s1, %s1444_s17  }
  0x24   :  { %s1445_s20 = smov [#allocation8]   ;;  %s1389_s24 = scalar_lea.hbm %s1579_s2, 5120 }
  0x25   :  { %s42_s21 = sshll.u32 %s1445_s20, 4  ;;  %p1390_p2 = scmp.ne.s32.totalorder %s1579_s2, %s1389_s24  ;;  %s43_s21 = int_to_ptr.vmem [resolvable:$true] %s42_s21 }
  0x26   :  { %p1393_p3 = scmp.lt.u32.totalorder %s1389_s24, %s1579_s2 }
  0x28   :  { %p1395_p4 = pnand %p1393_p3, %p1390_p2 }
  0x2a   :  { %1398 = shalt.err (!%p1395_p4)
}
  0x2b   :  { %s1399_s6 = scalar_lea.vmem %s43_s21, 5120  ;;  %p1404_p6 = scmp.lt.s32.totalorder %s43_s21, %s43_s21 }
  0x2c   :  { %p1400_p5 = scmp.ne.s32.totalorder %s43_s21, %s1399_s6  ;;  %p1405_p7 = scmp.lt.s32.totalorder %s1399_s6, %s1399_s6 }
  0x2e   :  { %p1406_p8 = por %p1405_p7, %p1404_p6 }
  0x30   :  { %p1407_p9 = pnand %p1406_p8, %p1400_p5 }
  0x32   :  { %1410 = shalt.err (!%p1407_p9)
}
  0x33   :  { %48 = dma.hbm_to_vmem [thread:$0]  %s1579_s2, 5120, %s43_s21, [#allocation7], %s1440_s28, %s1440_s28, %s1441_s29  }
  0x34   :  { %1433 = dma.done.wait [#allocation4], 256  }
  0x35   :  { %1434 = vsyncadd [#allocation4], 4294967040 }
  0x36   :  { %1435 = dma.done.wait [#allocation7], 10240  }
  0x37   :  { %1436 = vsyncadd [#allocation7], 4294957056  ;;  %v1446_v0 = vmov 0.0   ;;  %v1265_v1 = vld [vmem:[#allocation6 + $0x40] sm:$0xff]   ;;  %v1269_v5 = vld [vmem:[#allocation6 + $0x48] sm:$0xff]   ;;  %vm1447_vm0 = vmmov 0  }
  0x38   :  { %63 = vst [vmem:[#allocation2] sm:$0x3] %v1446_v0  ;;  %64 = vst [vmem:[#allocation2 + $0x12] sm:$0x3] %v1446_v0  ;;  %v1266_v2 = vld [vmem:[#allocation6] sm:$0xff]   ;;  %1109 = vmatprep.subr.bf16.mxu0 %v1265_v1  ;;  %v1270_v6 = vld [vmem:[#allocation6 + $0x8] sm:$0xff]  }
  0x39   :  { %v1267_v3 = vld [vmem:[#allocation6 + $0xc0] sm:$0xff]   ;;  %1110 = vmatpush3.bf16.msra.mxu0 %v1266_v2  ;;  %v1271_v7 = vld [vmem:[#allocation6 + $0xc8] sm:$0xff]   ;;  %v1273_v9 = vld [vmem:[#allocation6 + $0x50] sm:$0xff]  }
  0x3a   :  { %v1268_v4 = vld [vmem:[#allocation6 + $0x80] sm:$0xff]   ;;  %1131 = vmatprep.subr.bf16.mxu1 %v1267_v3  ;;  %1111 = vmatprep.subr.bf16.mxu0 %v1269_v5  ;;  %v1272_v8 = vld [vmem:[#allocation6 + $0x88] sm:$0xff]   ;;  %v1274_v10 = vld [vmem:[#allocation6 + $0x10] sm:$0xff]  }
  0x3b   :  { %1132 = vmatpush3.bf16.msra.mxu1 %v1268_v4  ;;  %v1275_v11 = vld [vmem:[#allocation6 + $0xd0] sm:$0xff]   ;;  %v1277_v13 = vld [vmem:[#allocation6 + $0x58] sm:$0xff]   ;;  %v1281_v17 = vld [vmem:[#allocation6 + $0x60] sm:$0xff]  }
  0x3c   :  { %1133 = vmatprep.subr.bf16.mxu1 %v1271_v7  ;;  %v1276_v12 = vld [vmem:[#allocation6 + $0x90] sm:$0xff]   ;;  %v1278_v14 = vld [vmem:[#allocation6 + $0x18] sm:$0xff]   ;;  %v1282_v18 = vld [vmem:[#allocation6 + $0x20] sm:$0xff]  }
  0x3d   :  { %1112 = vmatpush3.bf16.msra.mxu0 %v1270_v6  ;;  %v1279_v15 = vld [vmem:[#allocation6 + $0xd8] sm:$0xff]   ;;  %v1283_v19 = vld [vmem:[#allocation6 + $0xe0] sm:$0xff]   ;;  %v1285_v21 = vld [vmem:[#allocation6 + $0x68] sm:$0xff]  }
  0x3e   :  { %1113 = vmatprep.subr.bf16.mxu0 %v1273_v9  ;;  %v1280_v16 = vld [vmem:[#allocation6 + $0x98] sm:$0xff]   ;;  %v1284_v20 = vld [vmem:[#allocation6 + $0xa0] sm:$0xff]   ;;  %v1286_v22 = vld [vmem:[#allocation6 + $0x28] sm:$0xff]  }
  0x3f   :  { %1134 = vmatpush3.bf16.msra.mxu1 %v1272_v8  ;;  %v1287_v23 = vld [vmem:[#allocation6 + $0xe8] sm:$0xff]   ;;  %v1289_v25 = vld [vmem:[#allocation6 + $0x70] sm:$0xff]   ;;  %v1293_v29 = vld [vmem:[#allocation6 + $0x78] sm:$0xff]  }
  0x40   :  { %1135 = vmatprep.subr.bf16.mxu1 %v1275_v11  ;;  %v1288_v24 = vld [vmem:[#allocation6 + $0xa8] sm:$0xff]   ;;  %v1290_v26 = vld [vmem:[#allocation6 + $0x30] sm:$0xff]   ;;  %v1294_v30 = vld [vmem:[#allocation6 + $0x38] sm:$0xff]  }
  0x41   :  { %1114 = vmatpush3.bf16.msra.mxu0 %v1274_v10  ;;  %v1291_v27 = vld [vmem:[#allocation6 + $0xf0] sm:$0xff]   ;;  %v1295_v31 = vld [vmem:[#allocation6 + $0xf8] sm:$0xff]   ;;  %v1297_v35 = vld [vmem:[#allocation6 + $0x100] sm:$0xff]  }
  0x42   :  { %1115 = vmatprep.subr.bf16.mxu0 %v1277_v13  ;;  %v1292_v28 = vld [vmem:[#allocation6 + $0xb0] sm:$0xff]   ;;  %v66_v33 = vld [vmem:[#allocation3 + $0x8] sm:$0xff]  ;;  %v1298_v46 = vld [vmem:[#allocation6 + $0x108] sm:$0xff]  }
  0x43   :  { %1136 = vmatpush3.bf16.msra.mxu1 %v1276_v12  ;;  %v65_v32 = vld [vmem:[#allocation3] sm:$0xff]  ;;  %68 = vst [vmem:[#allocation2 + $0xa] sm:$0xff] %v66_v33  ;;  %v1296_v34 = vld [vmem:[#allocation6 + $0xb8] sm:$0xff]   ;;  %v1301_v49 = vld [vmem:[#allocation6 + $0x120] sm:$0xff]  }
  0x44   :  { %1137 = vmatprep.subr.bf16.mxu1 %v1279_v15  ;;  %67 = vst [vmem:[#allocation2 + $0x2] sm:$0xff] %v65_v32  ;;  %v81_v43 = vpack.c.bf16 %v66_v33, %v65_v32  ;;  %v1299_v47 = vld [vmem:[#allocation6 + $0x110] sm:$0xff]   ;;  %v1300_v48 = vld [vmem:[#allocation6 + $0x118] sm:$0xff]   ;;  %v1302_v50 = vld [vmem:[#allocation6 + $0x128] sm:$0xff]  }
  0x45   :  { %1116 = vmatpush3.bf16.msra.mxu0 %v1278_v14  ;;  %v1303_v51 = vld [vmem:[#allocation6 + $0x130] sm:$0xff]   ;;  %v1304_v52 = vld [vmem:[#allocation6 + $0x138] sm:$0xff]   ;;  %v1305_v56 = vld [vmem:[#allocation8 + $0x40] sm:$0xff]  }
  0x46   :  { %1117 = vmatprep.subr.bf16.mxu0 %v1281_v17  ;;  %v1306_v57 = vld [vmem:[#allocation8] sm:$0xff]   ;;  %v1309_v60 = vld [vmem:[#allocation8 + $0x48] sm:$0xff]   ;;  %v1313_v1 = vld [vmem:[#allocation8 + $0x50] sm:$0xff]  }
  0x47   :  { %1138 = vmatpush3.bf16.msra.mxu1 %v1280_v16  ;;  %v1307_v58 = vld [vmem:[#allocation8 + $0xc0] sm:$0xff]   ;;  %v1311_v61 = vld [vmem:[#allocation8 + $0xc8] sm:$0xff]   ;;  %v1315_v2 = vld [vmem:[#allocation8 + $0xd0] sm:$0xff]  }
  0x48   :  { %1139 = vmatprep.subr.bf16.mxu1 %v1283_v19  ;;  %v1308_v59 = vld [vmem:[#allocation8 + $0x80] sm:$0xff]   ;;  %v1310_v62 = vld [vmem:[#allocation8 + $0x8] sm:$0xff]   ;;  %v1314_v3 = vld [vmem:[#allocation8 + $0x10] sm:$0xff]  }
  0x49   :  { %1118 = vmatpush3.bf16.msra.mxu0 %v1282_v18  ;;  %v1312_v63 = vld [vmem:[#allocation8 + $0x88] sm:$0xff]   ;;  %v1316_v4 = vld [vmem:[#allocation8 + $0x90] sm:$0xff]   ;;  %v1317_v5 = vld [vmem:[#allocation8 + $0x58] sm:$0xff]  }
  0x4a   :  { %1119 = vmatprep.subr.bf16.mxu0 %v1285_v21  ;;  %v76_v42 = vld [vmem:[#allocation2 + $0xb] sm:$0xff]  ;;  %v1319_v6 = vld [vmem:[#allocation8 + $0xd8] sm:$0xff]   ;;  %v1329_v17 = vld [vmem:[#allocation8 + $0x70] sm:$0xff]  }
  0x4b   :  { %1140 = vmatpush3.bf16.msra.mxu1 %v1284_v20  ;;  %v71_v36 = vld [vmem:[#allocation2 + $0x1] sm:$0xff]  ;;  %v72_v37 = vld [vmem:[#allocation2 + $0x9] sm:$0xff]  ;;  %v1330_v18 = vld [vmem:[#allocation8 + $0x30] sm:$0xff]  }
  0x4c   :  { %1141 = vmatprep.subr.bf16.mxu1 %v1287_v23  ;;  %v69_v38 = vld [vmem:[#allocation2] sm:$0xff]  ;;  %v80_v39 = vpack.c.bf16 %v72_v37, %v71_v36  ;;  %v70_v40 = vld [vmem:[#allocation2 + $0x8] sm:$0xff]  ;;  %v1325_v13 = vld [vmem:[#allocation8 + $0x68] sm:$0xff]  }
  0x4d   :  { %1120 = vmatpush3.bf16.msra.mxu0 %v1286_v22  ;;  %v75_v41 = vld [vmem:[#allocation2 + $0x3] sm:$0xff]  ;;  %v79_v44 = vpack.c.bf16 %v70_v40, %v69_v38  ;;  %v78_v54 = vld [vmem:[#allocation2 + $0xc] sm:$0xff]  ;;  %v1331_v19 = vld [vmem:[#allocation8 + $0xf0] sm:$0xff]  }
  0x4e   :  { %1121 = vmatprep.subr.bf16.mxu0 %v1289_v25  ;;  %v82_v45 = vpack.c.bf16 %v76_v42, %v75_v41  ;;  %443 = vmatprep.mubr.bf16.mxu0 %v80_v39  ;;  %v77_v53 = vld [vmem:[#allocation2 + $0x4] sm:$0xff]  ;;  %v1326_v14 = vld [vmem:[#allocation8 + $0x28] sm:$0xff]   ;;  %v1332_v20 = vld [vmem:[#allocation8 + $0xb0] sm:$0xff]  }
  0x4f   :  { %1142 = vmatpush3.bf16.msra.mxu1 %v1288_v24  ;;  %v83_v55 = vpack.c.bf16 %v78_v54, %v77_v53  ;;  %v1318_v7 = vld [vmem:[#allocation8 + $0x18] sm:$0xff]   ;;  %v1321_v9 = vld [vmem:[#allocation8 + $0x60] sm:$0xff]   ;;  %v1327_v15 = vld [vmem:[#allocation8 + $0xe8] sm:$0xff]  }
  0x50   :  { %1143 = vmatprep.subr.bf16.mxu1 %v1291_v27  ;;  %484 = vmatprep.mubr.bf16.mxu1 %v82_v45  ;;  %v1320_v8 = vld [vmem:[#allocation8 + $0x98] sm:$0xff]   ;;  %v1322_v10 = vld [vmem:[#allocation8 + $0x20] sm:$0xff]   ;;  %v1328_v16 = vld [vmem:[#allocation8 + $0xa8] sm:$0xff]  }
  0x51   :  { %1122 = vmatpush3.bf16.msra.mxu0 %v1290_v26  ;;  %v1323_v11 = vld [vmem:[#allocation8 + $0xe0] sm:$0xff]   ;;  %v1333_v21 = vld [vmem:[#allocation8 + $0x78] sm:$0xff]  }
  0x52   :  { %1123 = vmatprep.subr.bf16.mxu0 %v1293_v29  ;;  %v1324_v12 = vld [vmem:[#allocation8 + $0xa0] sm:$0xff]   ;;  %v1335_v22 = vld [vmem:[#allocation8 + $0xf8] sm:$0xff]  }
  0x53   :  { %1144 = vmatpush3.bf16.msra.mxu1 %v1292_v28  ;;  %v1334_v23 = vld [vmem:[#allocation8 + $0x38] sm:$0xff]  }
  0x54   :  { %1145 = vmatprep.subr.bf16.mxu1 %v1295_v31  ;;  %v1336_v24 = vld [vmem:[#allocation8 + $0xb8] sm:$0xff]  }
  0x55   :  { %1124 = vmatpush3.bf16.msra.mxu0 %v1294_v30  ;;  %v1027_v26 = vld [vmem:[%s1580_s3] ss:$0 sm:$0xff] }
  0x56   :  { %1215 = vmatprep.subr.bf16.mxu0 %v1446_v0 }
  0x57   :  { %1146 = vmatpush3.bf16.msra.mxu1 %v1296_v34 }
  0x58   :  { %444 = vmatmul.mubr.bf16.vlgmr.msra.gmra.mrb[0].mxu0 %v79_v44  ;;  %1162 = vmatprep.subr.bf16.mxu1 %v1305_v56 }
  0x59   :  { %1216 = vmatpush3.bf16.msra.mxu0 %v1297_v35  ;;  %1231 = vmatprep.mubr.msk.bf16.mxu0 %vm1447_vm0, %v1446_v0 }
  0x5a   :  { %485 = vmatmul.mubr.bf16.vlgmr.msra.gmra.mrb[0].mxu1 %v81_v43  ;;  %1217 = vmatprep.subr.bf16.mxu0 %v1446_v0 }
  0x5b   :  { %1163 = vmatpush3.bf16.msra.mxu1 %v1306_v57 }
  0x5c   :  { %1164 = vmatprep.subr.bf16.mxu1 %v1309_v60 }
  0x5d   :  { %1218 = vmatpush3.bf16.msra.mxu0 %v1298_v46 }
  0x5e   :  { %1219 = vmatprep.subr.bf16.mxu0 %v1446_v0 }
  0x5f   :  { %1165 = vmatpush3.bf16.msra.mxu1 %v1310_v62  ;;  %v1339_v62 = vld [vmem:[#allocation8 + $0x110] sm:$0xff]  }
  0x60   :  { %1166 = vmatprep.subr.bf16.mxu1 %v1313_v1  ;;  %v1341_v1 = vld [vmem:[#allocation8 + $0x120] sm:$0xff]  }
  0x61   :  { %1220 = vmatpush3.bf16.msra.mxu0 %v1299_v47 }
  0x62   :  { %1221 = vmatprep.subr.bf16.mxu0 %v1446_v0 }
  0x63   :  { %1167 = vmatpush3.bf16.msra.mxu1 %v1314_v3  ;;  %v1343_v3 = vld [vmem:[#allocation8 + $0x130] sm:$0xff]  }
  0x64   :  { %1168 = vmatprep.subr.bf16.mxu1 %v1317_v5 }
  0x65   :  { %1222 = vmatpush3.bf16.msra.mxu0 %v1300_v48 }
  0x66   :  { %1223 = vmatprep.subr.bf16.mxu0 %v1446_v0 }
  0x67   :  { %1169 = vmatpush3.bf16.msra.mxu1 %v1318_v7 }
  0x68   :  { %1170 = vmatprep.subr.bf16.mxu1 %v1321_v9 }
  0x69   :  { %1224 = vmatpush3.bf16.msra.mxu0 %v1301_v49 }
  0x6a   :  { %1225 = vmatprep.subr.bf16.mxu0 %v1446_v0 }
  0x6b   :  { %1171 = vmatpush3.bf16.msra.mxu1 %v1322_v10  ;;  %v1068_v10 = vld [vmem:[%s1581_s4] ss:$0 sm:$0xff]  ;;  %s1448_s4 = smov [#allocation9]  }
  0x6c   :  { %1172 = vmatprep.subr.bf16.mxu1 %v1325_v13  ;;  %s1014_s8 = sshll.u32 %s1448_s4, 4  ;;  %s1015_s8 = int_to_ptr.vmem [resolvable:$true] %s1014_s8 }
  0x6d   :  { %1226 = vmatpush3.bf16.msra.mxu0 %v1302_v50  ;;  %s1411_s9 = scalar_lea.vmem %s1015_s8, 256  ;;  %p1416_p11 = scmp.lt.s32.totalorder %s1015_s8, %s1015_s8 }
  0x6e   :  { %1227 = vmatprep.subr.bf16.mxu0 %v1446_v0  ;;  %p1412_p10 = scmp.ne.s32.totalorder %s1015_s8, %s1411_s9  ;;  %p1417_p12 = scmp.lt.s32.totalorder %s1411_s9, %s1411_s9 }
  0x6f   :  { %1173 = vmatpush3.bf16.msra.mxu1 %v1326_v14 }
  0x70   :  { %1174 = vmatprep.subr.bf16.mxu1 %v1329_v17  ;;  %p1418_p13 = por %p1417_p12, %p1416_p11 }
  0x71   :  { %1228 = vmatpush3.bf16.msra.mxu0 %v1303_v51 }
  0x72   :  { %1229 = vmatprep.subr.bf16.mxu0 %v1446_v0  ;;  %p1419_p0 = pnand %p1418_p13, %p1412_p10 }
  0x73   :  { %1175 = vmatpush3.bf16.msra.mxu1 %v1330_v18 }
  0x74   :  { %1176 = vmatprep.subr.bf16.mxu1 %v1333_v21 }
  0x75   :  { %1230 = vmatpush3.bf16.msra.mxu0 %v1304_v52 }
  0x76   :  { %1184 = vmatprep.subr.bf16.mxu0 %v1307_v58  ;;  %v1337_v58 = vld [vmem:[#allocation8 + $0x100] sm:$0xff]  }
  0x77   :  { %1177 = vmatpush3.bf16.msra.mxu1 %v1334_v23 }
  0x78   :  { %1232 = vmatmul.mubr.bf16.vlgmr.msra.gmra.mrb[4].mxu0 %v83_v55  ;;  %1235 = vmatprep.subr.bf16.mxu1 %v1446_v0 }
  0x79   :  { %1185 = vmatpush3.bf16.msra.mxu0 %v1308_v59 }
  0x7a   :  { %1186 = vmatprep.subr.bf16.mxu0 %v1311_v61  ;;  %v1338_v61 = vld [vmem:[#allocation8 + $0x108] sm:$0xff]  }
  0x7d   :  { %1187 = vmatpush3.bf16.msra.mxu0 %v1312_v63  ;;  %v1340_v63 = vld [vmem:[#allocation8 + $0x118] sm:$0xff]  }
  0x7e   :  { %1188 = vmatprep.subr.bf16.mxu0 %v1315_v2  ;;  %v1342_v2 = vld [vmem:[#allocation8 + $0x128] sm:$0xff]  }
  0x81   :  { %1189 = vmatpush3.bf16.msra.mxu0 %v1316_v4  ;;  %v1344_v4 = vld [vmem:[#allocation8 + $0x138] sm:$0xff]  }
  0x82   :  { %1190 = vmatprep.subr.bf16.mxu0 %v1319_v6 }
  0x85   :  { %1191 = vmatpush3.bf16.msra.mxu0 %v1320_v8 }
  0x86   :  { %1192 = vmatprep.subr.bf16.mxu0 %v1323_v11 }
  0x89   :  { %1193 = vmatpush3.bf16.msra.mxu0 %v1324_v12 }
  0x8a   :  { %1194 = vmatprep.subr.bf16.mxu0 %v1327_v15 }
  0x8d   :  { %1195 = vmatpush3.bf16.msra.mxu0 %v1328_v16 }
  0x8e   :  { %1196 = vmatprep.subr.bf16.mxu0 %v1331_v19 }
  0x91   :  { %1197 = vmatpush3.bf16.msra.mxu0 %v1332_v20 }
  0x92   :  { %1198 = vmatprep.subr.bf16.mxu0 %v1335_v22 }
  0x95   :  { %1199 = vmatpush3.bf16.msra.mxu0 %v1336_v24 }
 0x12b   :  { %v1125_v25 = vpop.f32.mrb[0].mxu0 }
 0x12c   :  { %v1126_v27 = vpop.f32.mrb[1].mxu0 }
 0x12d   :  { %v1147_v28 = vpop.f32.mrb[0].mxu1  ;;  %v1127_v29 = vadd.f32 %v1126_v27, %v1125_v25  ;;  %v1128_v30 = vpop.f32.mrb[2].mxu0 }
 0x12e   :  { %v1148_v31 = vpop.f32.mrb[1].mxu1  ;;  %v1129_v32 = vpop.f32.mrb[3].mxu0 }
 0x12f   :  { %v1149_v33 = vadd.f32 %v1148_v31, %v1147_v28  ;;  %v1150_v34 = vpop.f32.mrb[2].mxu1  ;;  %v446_v35 = vadd.f32 %v1127_v29, %v1027_v26  ;;  %v1130_v36 = vadd.f32 %v1129_v32, %v1128_v30 }
 0x130   :  { %v1151_v37 = vpop.f32.mrb[3].mxu1 }
 0x131   :  { %v1152_v38 = vadd.f32 %v1151_v37, %v1150_v34  ;;  %v449_v39 = vadd.f32 %v1130_v36, %v1027_v26  ;;  %v487_v40 = vadd.f32 %v1149_v33, %v446_v35 }
 0x133   :  { %v490_v41 = vadd.f32 %v1152_v38, %v449_v39 }
 0x14b   :  { %v527_v42 = vpop.f32.mrb[4].mxu0 }
 0x14c   :  { %v528_v43 = vadd.f32 %v527_v42, %v487_v40  ;;  %v1233_v44 = vpop.f32.mrb[5].mxu0 }
 0x14d   :  { %v530_v45 = vpop.f32.mrb[6].mxu0 }
 0x14e   :  { %v1540_v46 = vmax.f32 %v528_v43, 0.0  ;;  %v531_v47 = vadd.f32 %v530_v45, %v490_v41  ;;  %v1234_v48 = vpop.f32.mrb[7].mxu0 }
 0x150   :  { %536 = vst [vmem:[#allocation2 + $0x2] sm:$0xff] %v1540_v46  ;;  %v1543_v49 = vmax.f32 %v531_v47, 0.0 }
 0x152   :  { %537 = vst [vmem:[#allocation2 + $0xa] sm:$0xff] %v1543_v49  ;;  %v550_v60 = vpack.c.bf16 %v1543_v49, %v1540_v46 }
 0x157   :  { %v540_v50 = vld [vmem:[#allocation2 + $0x1] sm:$0xff] }
 0x158   :  { %v538_v56 = vld [vmem:[#allocation2] sm:$0xff] }
 0x159   :  { %v541_v51 = vld [vmem:[#allocation2 + $0x9] sm:$0xff] }
 0x15a   :  { %v544_v52 = vld [vmem:[#allocation2 + $0x3] sm:$0xff]  ;;  %v545_v53 = vld [vmem:[#allocation2 + $0xb] sm:$0xff]  ;;  %v549_v54 = vpack.c.bf16 %v541_v51, %v540_v50 }
 0x15b   :  { %v551_v55 = vpack.c.bf16 %v545_v53, %v544_v52  ;;  %v539_v57 = vld [vmem:[#allocation2 + $0x8] sm:$0xff] }
 0x15c   :  { %v548_v59 = vpack.c.bf16 %v539_v57, %v538_v56  ;;  %912 = vmatprep.mubr.bf16.mxu1 %v549_v54  ;;  %v546_v5 = vld [vmem:[#allocation2 + $0x4] sm:$0xff]  ;;  %v547_v6 = vld [vmem:[#allocation2 + $0xc] sm:$0xff] }
 0x15d   :  { %953 = vmatprep.mubr.bf16.mxu0 %v551_v55  ;;  %v552_v7 = vpack.c.bf16 %v547_v6, %v546_v5 }
 0x15e   :  { %913 = vmatmul.mubr.bf16.vlgmr.msra.gmra.mrb[4].mxu1 %v548_v59  ;;  %954 = vmatmul.mubr.bf16.vlgmr.msra.gmra.mrb[8].mxu0 %v550_v60 }
 0x15f   :  { %1236 = vmatpush3.bf16.msra.mxu1 %v1337_v58  ;;  %1251 = vmatprep.mubr.msk.bf16.mxu1 %vm1447_vm0, %v1446_v0 }
 0x160   :  { %1237 = vmatprep.subr.bf16.mxu1 %v1446_v0 }
 0x163   :  { %1238 = vmatpush3.bf16.msra.mxu1 %v1338_v61 }
 0x164   :  { %1239 = vmatprep.subr.bf16.mxu1 %v1446_v0 }
 0x167   :  { %1240 = vmatpush3.bf16.msra.mxu1 %v1339_v62 }
 0x168   :  { %1241 = vmatprep.subr.bf16.mxu1 %v1446_v0 }
 0x16b   :  { %1242 = vmatpush3.bf16.msra.mxu1 %v1340_v63 }
 0x16c   :  { %1243 = vmatprep.subr.bf16.mxu1 %v1446_v0 }
 0x16f   :  { %1244 = vmatpush3.bf16.msra.mxu1 %v1341_v1 }
 0x170   :  { %1245 = vmatprep.subr.bf16.mxu1 %v1446_v0 }
 0x173   :  { %1246 = vmatpush3.bf16.msra.mxu1 %v1342_v2 }
 0x174   :  { %1247 = vmatprep.subr.bf16.mxu1 %v1446_v0 }
 0x177   :  { %1248 = vmatpush3.bf16.msra.mxu1 %v1343_v3 }
 0x178   :  { %1249 = vmatprep.subr.bf16.mxu1 %v1446_v0 }
 0x17b   :  { %1250 = vmatpush3.bf16.msra.mxu1 %v1344_v4 }
 0x17e   :  { %1252 = vmatmul.mubr.bf16.vlgmr.msra.gmra.mrb[8].mxu1 %v552_v7 }
 0x231   :  { %v1178_v8 = vpop.f32.mrb[4].mxu1  ;;  %v1200_v9 = vpop.f32.mrb[8].mxu0 }
 0x232   :  { %v1179_v11 = vpop.f32.mrb[5].mxu1  ;;  %v1201_v12 = vpop.f32.mrb[9].mxu0 }
 0x233   :  { %v1180_v13 = vadd.f32 %v1179_v11, %v1178_v8  ;;  %v1202_v14 = vadd.f32 %v1201_v12, %v1200_v9  ;;  %v1181_v15 = vpop.f32.mrb[6].mxu1  ;;  %v1203_v16 = vpop.f32.mrb[10].mxu0 }
 0x234   :  { %v1182_v17 = vpop.f32.mrb[7].mxu1  ;;  %v1204_v18 = vpop.f32.mrb[11].mxu0 }
 0x235   :  { %v915_v0 = vadd.f32 %v1180_v13, %v1068_v10  ;;  %v1183_v19 = vadd.f32 %v1182_v17, %v1181_v15  ;;  %v1205_v20 = vadd.f32 %v1204_v18, %v1203_v16 }
 0x237   :  { %v918_v21 = vadd.f32 %v1183_v19, %v1068_v10  ;;  %v956_v22 = vadd.f32 %v1202_v14, %v915_v0 }
 0x239   :  { %v959_v23 = vadd.f32 %v1205_v20, %v918_v21 }
 0x251   :  { %v996_v24 = vpop.f32.mrb[8].mxu1 }
 0x252   :  { %v997_v25 = vadd.f32 %v996_v24, %v956_v22  ;;  %v1253_v26 = vpop.f32.mrb[9].mxu1 }
 0x253   :  { %v999_v27 = vpop.f32.mrb[10].mxu1 }
 0x254   :  { %v1003_v28 = vadd.f32 %v997_v25, %v1540_v46  ;;  %v1000_v29 = vadd.f32 %v999_v27, %v959_v23  ;;  %v1254_v30 = vpop.f32.mrb[11].mxu1 }
 0x256   :  { %v1005_v31 = vmax.f32 %v1003_v28, 0.0  ;;  %v1004_v32 = vadd.f32 %v1000_v29, %v1543_v49 }
 0x258   :  { %1007 = vst [vmem:[#allocation9] sm:$0xff] %v1005_v31  ;;  %v1006_v33 = vmax.f32 %v1004_v32, 0.0 }
 0x25a   :  { %1008 = vst [vmem:[#allocation9 + $0x8] sm:$0xff] %v1006_v33 }
 0x25b   :  { %1422 = shalt.err (!%p1419_p0)
}
 0x25c   :  { %s1423_s12 = scalar_lea.hbm %s1582_s5, 256 }
 0x25d   :  { %p1424_p1 = scmp.ne.s32.totalorder %s1582_s5, %s1423_s12  ;;  %p1427_p2 = scmp.lt.u32.totalorder %s1423_s12, %s1582_s5 }
 0x25f   :  { %p1429_p3 = pnand %p1427_p2, %p1424_p1 }
 0x261   :  { %1432 = shalt.err (!%p1429_p3)
}
 0x262   :  { %1020 = dma.vmem_to_hbm [thread:$0]  %s1015_s8, 256, %s1582_s5, [#allocation5], %s1443_s1, %s1443_s1, %s1444_s17  }
 0x263   :  { %1437 = dma.done.wait [#allocation5], 256  }
 0x264   :  { %1438 = vsyncadd [#allocation5], 4294967040 }
 0x265   :  { %1024 = vsyncpa [#allocation4], 1 }
 0x266   :  { %1025 = vsyncpa [#allocation7], 1 }
 0x267   :  { %1026 = vsyncpa [#allocation5], 1 }

</bundles_post_ra>
